<compile_context>
chip_gen: v5e
topology: v5e:2x2
jax: 0.10.0
libtpu: 0.0.40
codegen_flags: <defaults>
</compile_context>

<pallas_src>
import jax
import jax.numpy as jnp
from jax.experimental import pallas as pl
from jax.experimental.pallas import tpu as pltpu


def _round_up(x, m):
    return ((x + m - 1) // m) * m


def _embed_onehot_kernel(ids_ref, tab_ref, out_ref, acc_ref):
    # ids_ref: (T, 1)   int32  token ids for this token block
    # tab_ref: (Vc, Dp) float  one vocab chunk of the (padded) embedding table
    # out_ref: (T, Dp)  float  output rows for this token block
    # acc_ref: (T, Dp)  f32    accumulator carried across the vocab axis
    v = pl.program_id(1)

    @pl.when(v == 0)
    def _():
        acc_ref[...] = jnp.zeros_like(acc_ref)

    T = ids_ref.shape[0]
    Vc = tab_ref.shape[0]

    ids = ids_ref[...]                                                # (T, 1)
    rows = jax.lax.broadcasted_iota(jnp.int32, (T, Vc), 1) + v * Vc   # (T, Vc)
    one_hot = (rows == ids).astype(tab_ref.dtype)                     # (T, Vc)
    acc_ref[...] += jnp.dot(one_hot, tab_ref[...],
                            preferred_element_type=jnp.float32)

    @pl.when(v == pl.num_programs(1) - 1)
    def _():
        out_ref[...] = acc_ref[...].astype(out_ref.dtype)


def embedder_forward(token_ids, embed_table, *,
                     max_block_tokens=256, max_vocab_chunk=512):
    """Embedding lookup (nn.Embedding forward) as a Pallas TPU kernel.

    token_ids:   (B, S) integer array
    embed_table: (vocab_size, d_model) float array
    returns:     (B, S, d_model) in embed_table.dtype
    """
    B, S = token_ids.shape
    V, D = embed_table.shape

    flat_ids = token_ids.reshape(-1).astype(jnp.int32)   # matches x.int()
    # PyTorch raises on out-of-range ids; clamp so no OOB access can happen.
    flat_ids = jnp.clip(flat_ids, 0, V - 1)
    n = flat_ids.shape[0]

    # Token block: sublane-aligned (>= 8), capped at max_block_tokens.
    T = max_block_tokens if n >= max_block_tokens else _round_up(n, 8)
    n_pad = _round_up(n, T)
    # Vocab chunk: lane-aligned (multiple of 128) so the MXU contraction dim
    # is dense; chunking keeps the resident table block bounded for big V.
    Vc = max_vocab_chunk if V >= max_vocab_chunk else _round_up(V, 128)
    V_pad = _round_up(V, Vc)
    # Lane-dense output blocks.
    D_pad = _round_up(D, 128)

    ids_col = jnp.pad(flat_ids, (0, n_pad - n)).reshape(n_pad, 1)
    tab = embed_table
    if (V_pad, D_pad) != (V, D):
        tab = jnp.pad(embed_table, ((0, V_pad - V), (0, D_pad - D)))

    n_tok_blocks = n_pad // T
    n_voc_blocks = V_pad // Vc
    itemsize = jnp.dtype(embed_table.dtype).itemsize

    cost = pl.CostEstimate(
        flops=2 * n_pad * V_pad * D_pad,
        transcendentals=0,
        bytes_accessed=(V_pad * D_pad * itemsize * n_tok_blocks
                        + n_pad * 4
                        + n_pad * D_pad * itemsize),
    )

    out = pl.pallas_call(
        _embed_onehot_kernel,
        out_shape=jax.ShapeDtypeStruct((n_pad, D_pad), embed_table.dtype),
        grid_spec=pltpu.PrefetchScalarGridSpec(
            num_scalar_prefetch=0,
            grid=(n_tok_blocks, n_voc_blocks),
            in_specs=[
                # Token ids for this block: (T, 1); trailing dim == full dim.
                pl.BlockSpec((T, 1), lambda i, v: (i, 0)),
                # Vocab chunk of the table; index constant in i, so it is
                # re-used across token blocks (single chunk for small vocabs).
                pl.BlockSpec((Vc, D_pad), lambda i, v: (v, 0)),
            ],
            out_specs=pl.BlockSpec((T, D_pad), lambda i, v: (i, 0)),
            scratch_shapes=[pltpu.VMEM((T, D_pad), jnp.float32)],
        ),
        compiler_params=pltpu.CompilerParams(
            # Token axis independent -> megacore-shardable; vocab axis is a
            # reduction carried in the accumulator -> "arbitrary", innermost.
            dimension_semantics=("parallel", "arbitrary"),
        ),
        cost_estimate=cost,
    )(ids_col, tab)

    # TODO(synk): for very large V*D where streaming the whole table per token
    # block is too expensive, add a manual HBM-gather path (memory_space=pl.ANY
    # + per-row make_async_copy double-buffer); the one-hot MXU path is right
    # for small/medium vocabularies like this module's.
    return out[:n, :D].reshape(B, S, D)


if __name__ == "__main__":
    key = jax.random.PRNGKey(0)
    k_emb, k_tok = jax.random.split(key)

    vocab_size = 50
    d_model = 32
    batch, seq = 2, 8

    # Deterministic synthetic parameters (nn.Embedding weight ~ N(0, 1)).
    embed_table = jax.random.normal(k_emb, (vocab_size, d_model),
                                    dtype=jnp.float32)
    token_ids = jax.random.randint(k_tok, (batch, seq), 0, vocab_size,
                                   dtype=jnp.int32)

    out = embedder_forward(token_ids, embed_table)
    out = jax.block_until_ready(out)

    # Sanity check against plain-JAX reference gather.
    ref = jnp.take(embed_table, token_ids, axis=0)
    assert out.shape == (batch, seq, d_model)
    assert out.dtype == jnp.float32
    assert jnp.allclose(out, ref), "Pallas embedding mismatch vs reference"

    print("KERNEL_OK")
</pallas_src>

<mosaic_0001>
module attributes {stable_mosaic.version = 11 : i64} {
  func.func @_embed_onehot_kernel(%arg0: i32, %arg1: i32, %arg2: memref<16x1xi32, #tpu.memory_space<vmem>>, %arg3: memref<128x128xf32, #tpu.memory_space<vmem>>, %arg4: memref<16x128xf32, #tpu.memory_space<vmem>>, %arg5: memref<16x128xf32, #tpu.memory_space<vmem>>) attributes {dimension_semantics = [#tpu.dimension_semantics<parallel>, #tpu.dimension_semantics<arbitrary>], iteration_bounds = array<i64: 1, 1>, scalar_prefetch = 0 : i64, scratch_operands = 1 : i64, tpu.core_type = #tpu.core_type<tc>, window_params = [{transform_indices = @transform_0, window_bounds = array<i64: 16, 1>}, {transform_indices = @transform_1, window_bounds = array<i64: 128, 128>}, {transform_indices = @transform_2, window_bounds = array<i64: 16, 128>}]} {
    %c0_i32 = arith.constant 0 : i32
    %0 = arith.cmpi eq, %arg1, %c0_i32 : i32
    %1 = arith.extui %0 : i1 to i32
    %c0_i32_0 = arith.constant 0 : i32
    %2 = arith.cmpi ne, %1, %c0_i32_0 : i32
    scf.if %2 {
      %cst_10 = arith.constant 0.000000e+00 : f32
      %20 = vector.broadcast %cst_10 : f32 to vector<16x128xf32>
      %c0_11 = arith.constant 0 : index
      %c0_12 = arith.constant 0 : index
      %21 = vector.load %arg5[%c0_11, %c0_12] : memref<16x128xf32, #tpu.memory_space<vmem>>, vector<16x128xf32>
      tpu.vector_store %arg5[%c0_11, %c0_12], %20 {strides = array<i32>} : memref<16x128xf32, #tpu.memory_space<vmem>>, vector<16x128xf32>,
    } else {
    }
    %c0 = arith.constant 0 : index
    %c0_1 = arith.constant 0 : index
    %3 = vector.load %arg2[%c0, %c0_1] : memref<16x1xi32, #tpu.memory_space<vmem>>, vector<16x1xi32>
    %4 = tpu.iota {dimensions = array<i32: 1>} : vector<16x128xi32>
    %c128_i32 = arith.constant 128 : i32
    %5 = arith.muli %arg1, %c128_i32 : i32
    %6 = vector.broadcast %5 : i32 to vector<16x128xi32>
    %7 = arith.addi %4, %6 : vector<16x128xi32>
    %8 = vector.broadcast %3 : vector<16x1xi32> to vector<16x128xi32>
    %9 = arith.cmpi eq, %7, %8 : vector<16x128xi32>
    %10 = arith.extui %9 : vector<16x128xi1> to vector<16x128xi32>
    %11 = arith.sitofp %10 : vector<16x128xi32> to vector<16x128xf32>
    %c0_2 = arith.constant 0 : index
    %c0_3 = arith.constant 0 : index
    %12 = vector.load %arg5[%c0_2, %c0_3] : memref<16x128xf32, #tpu.memory_space<vmem>>, vector<16x128xf32>
    %c0_4 = arith.constant 0 : index
    %c0_5 = arith.constant 0 : index
    %13 = vector.load %arg3[%c0_4, %c0_5] : memref<128x128xf32, #tpu.memory_space<vmem>>, vector<128x128xf32>
    %cst = arith.constant dense<0.000000e+00> : vector<16x128xf32>
    %14 = tpu.matmul %11, %13, %cst {dimension_numbers = #tpu.dot_dimension_numbers<[1], [0], [0], [1], [0, 0, 1, 1], [], []>} : vector<16x128xf32>, vector<128x128xf32>, vector<16x128xf32> -> vector<16x128xf32>
    %15 = arith.addf %12, %14 : vector<16x128xf32>
    %c0_6 = arith.constant 0 : index
    %c0_7 = arith.constant 0 : index
    %16 = vector.load %arg5[%c0_6, %c0_7] : memref<16x128xf32, #tpu.memory_space<vmem>>, vector<16x128xf32>
    tpu.vector_store %arg5[%c0_6, %c0_7], %15 {strides = array<i32>} : memref<16x128xf32, #tpu.memory_space<vmem>>, vector<16x128xf32>,
    %c0_i32_8 = arith.constant 0 : i32
    %17 = arith.cmpi eq, %arg1, %c0_i32_8 : i32
    %18 = arith.extui %17 : i1 to i32
    %c0_i32_9 = arith.constant 0 : i32
    %19 = arith.cmpi ne, %18, %c0_i32_9 : i32
    scf.if %19 {
      %c0_10 = arith.constant 0 : index
      %c0_11 = arith.constant 0 : index
      %20 = vector.load %arg5[%c0_10, %c0_11] : memref<16x128xf32, #tpu.memory_space<vmem>>, vector<16x128xf32>
      %c0_12 = arith.constant 0 : index
      %c0_13 = arith.constant 0 : index
      %21 = vector.load %arg4[%c0_12, %c0_13] : memref<16x128xf32, #tpu.memory_space<vmem>>, vector<16x128xf32>
      tpu.vector_store %arg4[%c0_12, %c0_13], %20 {strides = array<i32>} : memref<16x128xf32, #tpu.memory_space<vmem>>, vector<16x128xf32>,
    } else {
    }
    return
  }
  func.func @transform_0(%arg0: i32, %arg1: i32) -> (i32, i32) {
    %c0_i32 = arith.constant 0 : i32
    %c0_i32_0 = arith.constant 0 : i32
    return %arg0, %c0_i32 : i32, i32
  }
  func.func @transform_1(%arg0: i32, %arg1: i32) -> (i32, i32) {
    %c0_i32 = arith.constant 0 : i32
    %c0_i32_0 = arith.constant 0 : i32
    return %arg1, %c0_i32 : i32, i32
  }
  func.func @transform_2(%arg0: i32, %arg1: i32) -> (i32, i32) {
    %c0_i32 = arith.constant 0 : i32
    %c0_i32_0 = arith.constant 0 : i32
    return %arg0, %c0_i32 : i32, i32
  }
}

</mosaic_0001>

<bundles_post_ra>
// kernel: tpu_custom_call.1
= control target key start
LH: loop header
LB: loop body
LE: loop exit
PB: predicated region body
PF: predicated region fallthrough
CT: control target
= control target key end

     0   :  { %7 = vsyncpa [#allocation4], 0  ;;  %s242_s0 = inlined_call_operand.vmem [shape: s32[16,1], index: 0, kind: input, shape index: {}]   ;;  %s243_s1 = inlined_call_operand.hbm [shape: f32[128,128], index: 1, kind: input, shape index: {}]   ;;  %s244_s2 = inlined_call_operand.hbm [shape: f32[16,128], index: 2, kind: output, shape index: {}]  }
   0x1   :  { %8 = vsyncpa [#allocation5], 0  ;;  %s15_s11 = sshll.u32 %s243_s1, 4  ;;  %s203_s12 = smov [#allocation3]   ;;  %s16_s11 = int_to_ptr.hbm [resolvable:$true] %s15_s11 }
   0x2   :  { %s17_s13 = sshll.u32 %s203_s12, 4  ;;  %s204_s14 = smov 128   ;;  %s18_s13 = int_to_ptr.vmem [resolvable:$true] %s17_s13 }
   0x3   :  { %s205_s15 = smov 8  }
   0x4   :  { %23 = dma.hbm_to_vmem [thread:$0]  %s16_s11, 2048, %s18_s13, [#allocation4], %s204_s14, %s204_s14, %s205_s15  }
   0x5   :  { %199 = dma.done.wait [#allocation4], 2048  }
   0x6   :  { %200 = vsyncadd [#allocation4], 4294965248  ;;  %v206_v0 = vmov 0   ;;  %v34_v1 = vld [vmem:[%s242_s0] sm:$0xff]  ;;  %v70_v2 = vld [vmem:[#allocation3 + $0x78] sm:$0xff]  ;;  %v36_v19 = vlaneseq  ;;  %v207_v22 = vmov 1.0  }
   0x7   :  { %150 = vset.pattern.permute.xlu0 %v206_v0  ;;  %71 = vmatpush.msra.mxu0 %v70_v2  ;;  %v69_v3 = vld [vmem:[#allocation3 + $0x70] sm:$0xff]  ;;  %v68_v4 = vld [vmem:[#allocation3 + $0x68] sm:$0xff]  ;;  %v67_v5 = vld [vmem:[#allocation3 + $0x60] sm:$0xff]  ;;  %s111_s22 = sshll.u32 %s244_s2, 4  ;;  %s112_s22 = int_to_ptr.hbm [resolvable:$true] %s111_s22 }
   0x8   :  { %42 = vperm.xlu0 %150, %v34_v1   ;;  %128 = vmatpush.msra.mxu1 %v70_v2  ;;  %v35_v6 = vld [vmem:[%s242_s0 + $0x8] sm:$0xff]  ;;  %v66_v7 = vld [vmem:[#allocation3 + $0x58] sm:$0xff]  ;;  %v65_v8 = vld [vmem:[#allocation3 + $0x50] sm:$0xff]  ;;  %v37_v20 = vand.u32 127, %v36_v19  ;;  %s208_s0 = smov [#allocation6]  }
   0x9   :  { %72 = vmatpush.msra.mxu0 %v69_v3  ;;  %v64_v9 = vld [vmem:[#allocation3 + $0x48] sm:$0xff]  ;;  %v63_v10 = vld [vmem:[#allocation3 + $0x40] sm:$0xff]  ;;  %v62_v11 = vld [vmem:[#allocation3 + $0x38] sm:$0xff]  ;;  %s109_s19 = sshll.u32 %s208_s0, 4  ;;  %s110_s19 = int_to_ptr.vmem [resolvable:$true] %s109_s19 }
   0xa   :  { %129 = vmatpush.msra.mxu1 %v69_v3  ;;  %v61_v12 = vld [vmem:[#allocation3 + $0x30] sm:$0xff]  ;;  %v60_v13 = vld [vmem:[#allocation3 + $0x28] sm:$0xff]  ;;  %v59_v14 = vld [vmem:[#allocation3 + $0x20] sm:$0xff] }
   0xb   :  { %73 = vmatpush.msra.mxu0 %v68_v4  ;;  %v58_v15 = vld [vmem:[#allocation3 + $0x18] sm:$0xff]  ;;  %v57_v16 = vld [vmem:[#allocation3 + $0x10] sm:$0xff]  ;;  %v56_v17 = vld [vmem:[#allocation3 + $0x8] sm:$0xff] }
   0xc   :  { %130 = vmatpush.msra.mxu1 %v68_v4  ;;  %v55_v18 = vld [vmem:[#allocation3] sm:$0xff] }
   0xd   :  { %74 = vmatpush.msra.mxu0 %v67_v5 }
   0xe   :  { %131 = vmatpush.msra.mxu1 %v67_v5 }
   0xf   :  { %75 = vmatpush.msra.mxu0 %v66_v7 }
  0x10   :  { %45 = vperm.xlu0 %150, %v35_v6   ;;  %132 = vmatpush.msra.mxu1 %v66_v7 }
  0x11   :  { %76 = vmatpush.msra.mxu0 %v65_v8 }
  0x12   :  { %133 = vmatpush.msra.mxu1 %v65_v8 }
  0x13   :  { %77 = vmatpush.msra.mxu0 %v64_v9 }
  0x14   :  { %134 = vmatpush.msra.mxu1 %v64_v9 }
  0x15   :  { %78 = vmatpush.msra.mxu0 %v63_v10 }
  0x16   :  { %135 = vmatpush.msra.mxu1 %v63_v10 }
  0x17   :  { %79 = vmatpush.msra.mxu0 %v62_v11 }
  0x18   :  { %136 = vmatpush.msra.mxu1 %v62_v11 }
  0x19   :  { %80 = vmatpush.msra.mxu0 %v61_v12 }
  0x1a   :  { %137 = vmatpush.msra.mxu1 %v61_v12 }
  0x1b   :  { %81 = vmatpush.msra.mxu0 %v60_v13 }
  0x1c   :  { %138 = vmatpush.msra.mxu1 %v60_v13 }
  0x1d   :  { %82 = vmatpush.msra.mxu0 %v59_v14 }
  0x1e   :  { %139 = vmatpush.msra.mxu1 %v59_v14 }
  0x1f   :  { %83 = vmatpush.msra.mxu0 %v58_v15 }
  0x20   :  { %140 = vmatpush.msra.mxu1 %v58_v15 }
  0x21   :  { %84 = vmatpush.msra.mxu0 %v57_v16 }
  0x22   :  { %141 = vmatpush.msra.mxu1 %v57_v16 }
  0x23   :  { %85 = vmatpush.msra.mxu0 %v56_v17 }
  0x24   :  { %142 = vmatpush.msra.mxu1 %v56_v17 }
  0x25   :  { %86 = vmatpush.msra.mxu0 %v55_v18 }
  0x26   :  { %143 = vmatpush.msra.mxu1 %v55_v18 }
  0x7a   :  { %v43_v21 = vpop.permute.xlu0 %42 }
  0x7b   :  { %vm47_vm0 = vcmp.eq.s32.totalorder %v37_v20, %v43_v21 }
  0x7c   :  { %126 = vmatmul.msk.f32.vlgmr.msra.gmra.mxu0 %vm47_vm0, %v207_v22 }
  0x82   :  { %v46_v23 = vpop.permute.xlu0 %45 }
  0x83   :  { %vm48_vm1 = vcmp.eq.s32.totalorder %v37_v20, %v46_v23 }
  0x84   :  { %127 = vmatmul.msk.f32.vlgmr.msra.gmra.mxu1 %vm48_vm1, %v207_v22 }
  0xf9   :  { %v88_v24 = vpop.f32.mrf.mxu0 }
  0xfa   :  { %103 = vst [vmem:[#allocation6] sm:$0xff] %v88_v24 }
 0x101   :  { %v91_v25 = vpop.f32.mrf.mxu1 }
 0x102   :  { %104 = vst [vmem:[#allocation6 + $0x8] sm:$0xff] %v91_v25 }
 0x103   :  { %117 = dma.vmem_to_hbm [thread:$0]  %s110_s19, 256, %s112_s22, [#allocation5], %s204_s14, %s204_s14, %s205_s15  }
 0x104   :  { %201 = dma.done.wait [#allocation5], 256  }
 0x105   :  { %202 = vsyncadd [#allocation5], 4294967040 }
 0x106   :  { %122 = vsyncpa [#allocation4], 1 }
 0x107   :  { %123 = vsyncpa [#allocation5], 1 }

</bundles_post_ra>
